<compile_context>
chip_gen: v6e
topology: v6e:2x2x1
jax: 0.10.0
libtpu: 0.0.40
codegen_flags: <defaults>
</compile_context>

<pallas_src>
import math

import jax
import jax.numpy as jnp
from jax.experimental import pallas as pl
from jax.experimental.pallas import tpu as pltpu


_TARGET_BLOCK_BYTES = 4 << 20          # ~4 MiB per buffer (2 in + 2 out = 16 MiB)
_VMEM_LIMIT_BYTES = 48 * 1024 * 1024   # safe on v5e/v6e (128 MiB) and v7x (64 MiB/TC)


def _copy_kernel(x_ref, o_ref):
    # Bit-exact tile copy through VMEM (materialized path only).
    o_ref[...] = x_ref[...]


def _choose_row_tile(rows, lanes, itemsize):
    """Sublane-aligned row tile of ~_TARGET_BLOCK_BYTES that (preferably)
    divides `rows` evenly and yields >= 2 grid steps when possible."""
    sub = 8 * max(1, 4 // itemsize)  # 8 for f32/i32, 16 for bf16, 32 for int8/fp8
    if rows <= sub:
        return rows  # full-extent first dim: always a legal block

    target_rows = max(sub, (_TARGET_BLOCK_BYTES // (lanes * itemsize)) // sub * sub)

    # Keep at least 2 grid steps so "parallel" can shard across v7x's 2 TCs.
    if rows >= 2 * sub:
        half = max(sub, (rows // 2) // sub * sub)
        cap = min(target_rows, half)
    else:
        cap = min(target_rows, rows)
    cap = max(sub, cap - (cap % sub))

    # Largest sublane-aligned tile <= cap that divides rows evenly
    # (avoids a masked partial last block -> every DMA is full-size).
    for cand in range(cap, sub - 1, -sub):
        if rows % cand == 0:
            return cand
    return cap  # accept one masked partial block (correct, minor perf cost)


def _tiled_copy_2d(x2):
    """Streaming HBM->HBM copy of a (rows, lanes) slab, lanes % 128 == 0."""
    rows, lanes = x2.shape
    itemsize = jnp.dtype(x2.dtype).itemsize
    row_tile = _choose_row_tile(rows, lanes, itemsize)
    grid = pl.cdiv(rows, row_tile)
    total_bytes = rows * lanes * itemsize

    return pl.pallas_call(
        _copy_kernel,
        out_shape=jax.ShapeDtypeStruct((rows, lanes), x2.dtype),
        grid=(grid,),
        in_specs=[pl.BlockSpec((row_tile, lanes), lambda i: (i, 0))],
        out_specs=pl.BlockSpec((row_tile, lanes), lambda i: (i, 0)),
        compiler_params=pltpu.CompilerParams(
            dimension_semantics=("parallel",),     # megacore sharding on v7x
            vmem_limit_bytes=_VMEM_LIMIT_BYTES,    # v5e default (16 MiB) too small
        ),
        cost_estimate=pl.CostEstimate(
            flops=0, transcendentals=0, bytes_accessed=2 * total_bytes),
    )(x2)


def _small_copy_full(x2):
    """Single full-array block copy (only used for tiny <128-element tails)."""
    itemsize = jnp.dtype(x2.dtype).itemsize
    return pl.pallas_call(
        _copy_kernel,
        out_shape=jax.ShapeDtypeStruct(x2.shape, x2.dtype),
        cost_estimate=pl.CostEstimate(
            flops=0, transcendentals=0, bytes_accessed=2 * x2.size * itemsize),
    )(x2)


def _pallas_identity_copy(x):
    """Materialized bit-exact copy of `x` via tiled, lane-dense Pallas kernels."""
    total = int(x.size)
    flat = x.reshape(-1)  # metadata-only

    # Widest lane-dense column width (multiple of 128) dividing the total.
    lanes = None
    for cand in (8192, 4096, 2048, 1024, 512, 256, 128):
        if total % cand == 0:
            lanes = cand
            break

    if lanes is not None:
        out_flat = _tiled_copy_2d(flat.reshape(total // lanes, lanes)).reshape(-1)
    else:
        # Odd total: tile the 128-aligned bulk, handle the tiny tail separately.
        lanes = 128
        bulk = (total // lanes) * lanes
        parts = []
        if bulk:
            parts.append(
                _tiled_copy_2d(flat[:bulk].reshape(bulk // lanes, lanes)).reshape(-1))
        tail = total - bulk
        if tail:
            parts.append(_small_copy_full(flat[bulk:].reshape(1, tail)).reshape(-1))
        out_flat = parts[0] if len(parts) == 1 else jnp.concatenate(parts)

    return out_flat.reshape(x.shape)


def reshape_forward(x, shape, *, materialize=False):
    """Pallas equivalent of Reshape(shape).forward(x).

    x: (B, C, H, W) array (NCHW, row-major, same layout as PyTorch).
    shape: (s0, s1) target trailing spatial dims.
    Returns: (B, C*H*W // (s0*s1), s0, s1)

    materialize=False (default): metadata-only reshape -- zero HBM traffic,
    exactly like torch .view().
    materialize=True: routes the bytes through the tiled Pallas copy kernel.
    """
    assert len(shape) == 2
    s0, s1 = shape
    B = x.shape[0]
    n = math.prod(x.shape[1:])
    assert n % (s0 * s1) == 0, "s0*s1 must divide the per-batch element count"
    out_shape = (B, n // (s0 * s1), s0, s1)

    if materialize:
        return _pallas_identity_copy(x).reshape(out_shape)
    return x.reshape(out_shape)


def reshape_inverse(x, *, materialize=False):
    """Pallas equivalent of Reshape.inverse(x): x.view(x.shape[0], -1)."""
    B = x.shape[0]
    n = math.prod(x.shape[1:])
    if materialize:
        return _pallas_identity_copy(x).reshape(B, n)
    return x.reshape(B, n)


if __name__ == "__main__":
    key = jax.random.PRNGKey(0)
    # Small NCHW input consistent with the module: B=2, C=4, H=W=16
    x = jax.random.normal(key, (2, 4, 16, 16), dtype=jnp.float32)
    target = (8, 8)  # Reshape((8, 8))

    # Reference (identical to torch .view semantics, row-major).
    y_ref = x.reshape(x.shape[0], -1, target[0], target[1])

    # 1) Preferred zero-cost path (no pallas_call, metadata-only).
    y_free = jax.block_until_ready(reshape_forward(x, target))
    assert y_free.shape == (2, 4 * 16 * 16 // (8 * 8), 8, 8), y_free.shape
    assert jnp.array_equal(y_free, y_ref), "free-path mismatch vs reference"

    # 2) Pallas-materialized path (tiled, lane-dense copy).
    y_pallas = jax.block_until_ready(reshape_forward(x, target, materialize=True))
    assert y_pallas.shape == y_ref.shape, y_pallas.shape
    assert jnp.array_equal(y_pallas, y_ref), "pallas-path mismatch vs reference"

    # Inverse round-trip through both paths.
    x_flat_ref = x.reshape(x.shape[0], -1)
    assert jnp.array_equal(reshape_inverse(y_free), x_flat_ref)
    x_back = jax.block_until_ready(reshape_inverse(y_pallas, materialize=True))
    assert jnp.array_equal(x_back, x_flat_ref)

    # 3) Robustness: odd-sized tensor (total=393, not a multiple of 128) goes
    #    through the bulk+tail fallback instead of a whole-array block.
    x_odd = jax.random.normal(key, (3, 131), dtype=jnp.float32)
    x_odd_copy = jax.block_until_ready(_pallas_identity_copy(x_odd))
    assert jnp.array_equal(x_odd_copy, x_odd), "odd-size fallback mismatch"

    # 4) Sub-32-bit dtype path (bf16) stays bit-exact.
    x_bf16 = x.astype(jnp.bfloat16)
    x_bf16_copy = jax.block_until_ready(_pallas_identity_copy(x_bf16))
    assert jnp.array_equal(x_bf16_copy, x_bf16), "bf16 copy mismatch"

    print("KERNEL_OK")
</pallas_src>

<mosaic_0001>
module attributes {stable_mosaic.version = 11 : i64} {
  func.func @_copy_kernel(%arg0: i32, %arg1: memref<1x2048xf32, #tpu.memory_space<vmem>>, %arg2: memref<1x2048xf32, #tpu.memory_space<vmem>>) attributes {dimension_semantics = [#tpu.dimension_semantics<parallel>], iteration_bounds = array<i64: 1>, scalar_prefetch = 0 : i64, scratch_operands = 0 : i64, tpu.core_type = #tpu.core_type<tc>, window_params = [{transform_indices = @transform_0, window_bounds = array<i64: 1, 2048>}, {transform_indices = @transform_1, window_bounds = array<i64: 1, 2048>}]} {
    %c0 = arith.constant 0 : index
    %c0_0 = arith.constant 0 : index
    %0 = vector.load %arg1[%c0, %c0_0] : memref<1x2048xf32, #tpu.memory_space<vmem>>, vector<1x2048xf32>
    %c0_1 = arith.constant 0 : index
    %c0_2 = arith.constant 0 : index
    %1 = vector.load %arg2[%c0_1, %c0_2] : memref<1x2048xf32, #tpu.memory_space<vmem>>, vector<1x2048xf32>
    tpu.vector_store %arg2[%c0_1, %c0_2], %0 {strides = array<i32>} : memref<1x2048xf32, #tpu.memory_space<vmem>>, vector<1x2048xf32>,
    return
  }
  func.func @transform_0(%arg0: i32) -> (i32, i32) {
    %c0_i32 = arith.constant 0 : i32
    %c0_i32_0 = arith.constant 0 : i32
    return %arg0, %c0_i32 : i32, i32
  }
  func.func @transform_1(%arg0: i32) -> (i32, i32) {
    %c0_i32 = arith.constant 0 : i32
    %c0_i32_0 = arith.constant 0 : i32
    return %arg0, %c0_i32 : i32, i32
  }
}

</mosaic_0001>

<bundles_post_ra>
// kernel: tpu_custom_call.1
= control target key start
LH: loop header
LB: loop body
LE: loop exit
PB: predicated region body
PF: predicated region fallthrough
CT: control target
= control target key end

     0   :  { %6 = vsyncpa [#allocation3], 0  ;;  %s104_s0 = inlined_call_operand.hbm [shape: f32[1,2048], index: 0, kind: input, shape index: {}]   ;;  %s105_s1 = inlined_call_operand.hbm [shape: f32[1,2048], index: 1, kind: output, shape index: {}]  }
   0x1   :  { %7 = vsyncpa [#allocation4], 0  ;;  %s86_s6 = smov [#allocation2]  }
   0x2   :  { %s14_s7 = sshll.u32 %s86_s6, 4  ;;  %s15_s7 = int_to_ptr.vmem [resolvable:$true] %s14_s7 }
   0x3   :  { %s50_s8 = scalar_lea.vmem %s15_s7, 256  ;;  %p55_p1 = scmp.lt.s32.totalorder %s15_s7, %s15_s7 }
   0x4   :  { %p51_p0 = scmp.ne.s32.totalorder %s15_s7, %s50_s8  ;;  %p56_p2 = scmp.lt.s32.totalorder %s50_s8, %s50_s8 }
   0x6   :  { %p57_p3 = por %p56_p2, %p55_p1 }
   0x8   :  { %p58_p4 = pnand %p57_p3, %p51_p0 }
   0xa   :  { %61 = shalt.err (!%p58_p4)
}
   0xb   :  { %17 = dma.hbm_to_vmem [thread:$0]  %s104_s0, 256, %s15_s7, [#allocation3]  }
   0xc   :  { %82 = dma.done.wait [#allocation3], 256  }
   0xd   :  { %83 = vsyncadd [#allocation3], 4294967040  ;;  %s87_s11 = smov [#allocation5]   ;;  %v21_v0 = vld [vmem:[#allocation2] sm:$0xff]  ;;  %v22_v1 = vld [vmem:[#allocation2 + $0x8] sm:$0xff] }
   0xe   :  { %s31_s12 = sshll.u32 %s87_s11, 4  ;;  %23 = vst [vmem:[#allocation5] sm:$0xff] %v21_v0  ;;  %24 = vst [vmem:[#allocation5 + $0x8] sm:$0xff] %v22_v1  ;;  %s32_s12 = int_to_ptr.vmem [resolvable:$true] %s31_s12 }
   0xf   :  { %s62_s13 = scalar_lea.vmem %s32_s12, 256  ;;  %p67_p6 = scmp.lt.s32.totalorder %s32_s12, %s32_s12 }
  0x10   :  { %p63_p5 = scmp.ne.s32.totalorder %s32_s12, %s62_s13  ;;  %p68_p7 = scmp.lt.s32.totalorder %s62_s13, %s62_s13 }
  0x12   :  { %p69_p8 = por %p68_p7, %p67_p6 }
  0x14   :  { %p70_p9 = pnand %p69_p8, %p63_p5 }
  0x16   :  { %73 = shalt.err (!%p70_p9)
}
  0x17   :  { %34 = dma.vmem_to_hbm [thread:$0]  %s32_s12, 256, %s105_s1, [#allocation4]  }
  0x18   :  { %84 = dma.done.wait [#allocation4], 256  }
  0x19   :  { %85 = vsyncadd [#allocation4], 4294967040 }
  0x1a   :  { %38 = vsyncpa [#allocation3], 1 }
  0x1b   :  { %39 = vsyncpa [#allocation4], 1 }

</bundles_post_ra>
